<compile_context>
chip_gen: v6e
topology: v6e:2x2x1
jax: 0.10.0
libtpu: 0.0.40
codegen_flags: <defaults>
</compile_context>

<pallas_src>
import functools

import jax
import jax.numpy as jnp
from jax.experimental import pallas as pl
from jax.experimental.pallas import tpu as pltpu

NUM_CLASSES = 80
ALPHA = 0.2          # module default
GAMMA = 2.0          # module default
EOS_COEF = 1e-4      # module default
WEIGHT_DICT = {"loss_vfl": 1.0, "loss_bbox": 5.0, "loss_giou": 2.0}

LANE = 128
SUBLANE = 8


# ----------------------------- VFL kernel -----------------------------

def _vfl_kernel(cls_ref, tsc_ref, logits_ref, out_ref, *, alpha, gamma):
    """Varifocal loss, one batch row per grid step (query-on-lanes layout).

    cls_ref:    [1, 1, Q] int32   target class per query (num_classes = no-object)
    tsc_ref:    [1, 1, Q] f32     IoU score of the matched GT box (0 if unmatched)
    logits_ref: [1, C, Q] any-dt  raw class logits (cast to f32 in-kernel)
    out_ref:    [1, 8, 128] f32   per-batch sum, broadcast into a lane-dense tile
    """
    x = logits_ref[...].astype(jnp.float32)          # [1, C, Q]
    cls = cls_ref[...]                               # [1, 1, Q] int32
    ts = tsc_ref[...]                                # [1, 1, Q] f32

    # In-kernel one-hot on the sublane (class) axis.  class == C (no-object)
    # never matches iota 0..C-1, which reproduces one_hot(...)[..., :-1].
    classes = jax.lax.broadcasted_iota(jnp.int32, x.shape, dimension=1)
    t = (classes == cls).astype(jnp.float32)         # [1, C, Q]
    ts_full = ts * t                                 # iou-weighted target

    # Shared transcendental: one exp feeds both sigmoid and the stable-BCE tail.
    e = jnp.exp(-jnp.abs(x))
    softplus = jnp.log1p(e)                          # log(1 + exp(-|x|))
    denom = 1.0 + e
    r = pl.reciprocal(denom, approx=True)            # EUP vrcp
    r = r * (2.0 - r * denom)                        # one Newton-Raphson refinement
    prob = jnp.where(x >= 0.0, r, e * r)             # == sigmoid(x)

    if gamma == 2.0:                                 # gamma is a Python float here
        mod = prob * prob
    else:
        mod = prob ** gamma
    weight = alpha * mod * (1.0 - t) + ts_full

    # binary_cross_entropy_with_logits(x, ts_full), numerically stable form
    bce = jnp.maximum(x, 0.0) - x * ts_full + softplus

    total = jnp.sum(weight * bce)
    out_ref[...] = jnp.full(out_ref.shape, total, jnp.float32)


def vfl_loss_sum(pred_logits, target_classes, target_score, alpha, gamma):
    """Sum over all (b, q, c) of the VFL elementwise loss (torch: loss.sum())."""
    B, Q, C = pred_logits.shape
    # Query-on-lanes layout: logits [B, C, Q] (native dtype), cls/tsc [B, 1, Q].
    logits_t = jnp.transpose(pred_logits, (0, 2, 1))
    cls3 = target_classes.astype(jnp.int32)[:, None, :]     # [B, 1, Q]
    tsc3 = target_score.astype(jnp.float32)[:, None, :]     # [B, 1, Q]

    kernel = functools.partial(_vfl_kernel, alpha=float(alpha), gamma=float(gamma))
    out = pl.pallas_call(
        kernel,
        out_shape=jax.ShapeDtypeStruct((B, SUBLANE, LANE), jnp.float32),
        grid=(B,),
        in_specs=[
            pl.BlockSpec((1, 1, Q), lambda b: (b, 0, 0)),
            pl.BlockSpec((1, 1, Q), lambda b: (b, 0, 0)),
            pl.BlockSpec((1, C, Q), lambda b: (b, 0, 0)),
        ],
        out_specs=pl.BlockSpec((1, SUBLANE, LANE), lambda b: (b, 0, 0)),
        compiler_params=pltpu.CompilerParams(
            dimension_semantics=("parallel",)),
    )(cls3, tsc3, logits_t)
    return jnp.sum(out[:, 0, 0])


# ----------------------------- box kernel (lane-dense) -----------------------------

def _box_loss_kernel(m_ref, boxes_ref, out_ref):
    """Per matched pair: L1, (1 - GIoU), IoU — all as lane-dense [1, P] partials.

    m_ref:     SMEM (1,) int32  number of real (non-padded) matched pairs
    boxes_ref: [8, P] f32       rows 0-3 = src cxcywh, rows 4-7 = tgt cxcywh
    out_ref:   [3, P] f32       row 0 = L1 * v, row 1 = (1 - giou) * v, row 2 = iou * v
    """
    b = boxes_ref[...].astype(jnp.float32)           # [8, P]
    P = b.shape[1]
    lane = jax.lax.broadcasted_iota(jnp.int32, (1, P), dimension=1)
    v = (lane < m_ref[0]).astype(jnp.float32)        # [1, P] valid-pair mask

    scx, scy, sw, sh = b[0:1, :], b[1:2, :], b[2:3, :], b[3:4, :]
    tcx, tcy, tw, th = b[4:5, :], b[5:6, :], b[6:7, :], b[7:8, :]

    sx1, sy1, sx2, sy2 = scx - 0.5 * sw, scy - 0.5 * sh, scx + 0.5 * sw, scy + 0.5 * sh
    tx1, ty1, tx2, ty2 = tcx - 0.5 * tw, tcy - 0.5 * th, tcx + 0.5 * tw, tcy + 0.5 * th

    # L1 on raw (cx, cy, w, h) per pair
    l1 = (jnp.abs(scx - tcx) + jnp.abs(scy - tcy)
          + jnp.abs(sw - tw) + jnp.abs(sh - th))                        # [1, P]

    # IoU
    iw = jnp.maximum(jnp.minimum(sx2, tx2) - jnp.maximum(sx1, tx1), 0.0)
    ih = jnp.maximum(jnp.minimum(sy2, ty2) - jnp.maximum(sy1, ty1), 0.0)
    inter = iw * ih
    area_s = (sx2 - sx1) * (sy2 - sy1)
    area_t = (tx2 - tx1) * (ty2 - ty1)
    union = area_s + area_t - inter
    # guard only the zero padding lanes; real degenerate boxes match the reference
    union_safe = jnp.where(v > 0.0, union, 1.0)
    iou = inter / union_safe

    # GIoU (enclosing box)
    cw = jnp.maximum(sx2, tx2) - jnp.minimum(sx1, tx1)
    ch = jnp.maximum(sy2, ty2) - jnp.minimum(sy1, ty1)
    carea = cw * ch
    carea_safe = jnp.where(v > 0.0, carea, 1.0)
    giou = iou - (carea - union) / carea_safe

    out_ref[0:1, :] = l1 * v
    out_ref[1:2, :] = (1.0 - giou) * v
    out_ref[2:3, :] = iou * v


def box_losses(src_boxes, tgt_boxes, max_pairs=LANE):
    """src/tgt: [M, 4] cxcywh. Returns (sum L1, sum (1-giou), iou[M])."""
    M = src_boxes.shape[0]
    # Static 128-lane bucket (min 128) so the common M <= 128 case never recompiles.
    P = max(max_pairs, ((M + LANE - 1) // LANE) * LANE)
    boxes = jnp.concatenate(
        [jnp.transpose(src_boxes.astype(jnp.float32)),
         jnp.transpose(tgt_boxes.astype(jnp.float32))], axis=0)         # [8, M]
    boxes = jnp.pad(boxes, ((0, 0), (0, P - M)))
    m = jnp.array([M], jnp.int32)

    out = pl.pallas_call(
        _box_loss_kernel,
        out_shape=jax.ShapeDtypeStruct((3, P), jnp.float32),
        in_specs=[pl.BlockSpec(memory_space=pltpu.MemorySpace.SMEM),
                  pl.BlockSpec(memory_space=pltpu.MemorySpace.VMEM)],
        out_specs=pl.BlockSpec(memory_space=pltpu.MemorySpace.VMEM),
    )(m, boxes)
    l1_sum = jnp.sum(out[0, :])
    giou_sum = jnp.sum(out[1, :])
    iou = out[2, :M]
    return l1_sum, giou_sum, iou


# ----------------------------- glue / criterion -----------------------------

def _prepare_matched(outputs, targets, indices):
    """_get_src_permutation_idx + gathers (plain JAX glue)."""
    # TODO(synk): crashes if every image has zero GT boxes (empty concatenate),
    # matching the torch reference's behavior for that degenerate case.
    pred_boxes = outputs["pred_boxes"]
    batch_idx = jnp.concatenate(
        [jnp.full((src.shape[0],), i, jnp.int32) for i, (src, _) in enumerate(indices)])
    src_idx = jnp.concatenate([src for src, _ in indices])
    labels_o = jnp.concatenate(
        [t["labels"][j].astype(jnp.int32) for t, (_, j) in zip(targets, indices)])
    tgt_boxes = jnp.concatenate(
        [t["boxes"][j].astype(jnp.float32) for t, (_, j) in zip(targets, indices)], axis=0)
    src_boxes = pred_boxes[batch_idx, src_idx].astype(jnp.float32)
    return batch_idx, src_idx, labels_o, src_boxes, tgt_boxes


class SetCriterionPallas:
    """JAX/Pallas reimplementation of SetCriterion.forward (losses = ['vfl', 'boxes'])."""

    def __init__(self, weight_dict=WEIGHT_DICT, losses=("vfl", "boxes"),
                 alpha=ALPHA, gamma=GAMMA, eos_coef=EOS_COEF, num_classes=NUM_CLASSES):
        self.num_classes = num_classes
        self.weight_dict = dict(weight_dict)
        self.losses = list(losses)
        self.alpha = alpha
        self.gamma = gamma
        # deterministic buffer from __init__ (unused by the vfl/boxes losses)
        self.empty_weight = jnp.ones((num_classes + 1,), jnp.float32).at[-1].set(eos_coef)

    @staticmethod
    def _matcher(outputs, targets):
        # TODO(synk): the Hungarian matcher is an injected dependency of this module;
        # use a deterministic identity matching (target j <-> query j) in its place.
        return [(jnp.arange(int(t["labels"].shape[0]), dtype=jnp.int32),
                 jnp.arange(int(t["labels"].shape[0]), dtype=jnp.int32)) for t in targets]

    def __call__(self, outputs, targets):
        pred_logits = outputs["pred_logits"]        # keep native dtype (bf16-friendly)
        B, Q, C = pred_logits.shape
        indices = self._matcher(outputs, targets)

        # TODO(synk): num_boxes is a host-side constant here (no distributed all_reduce,
        # and target counts come from Python lists, so not jit-safe across batches).
        num_boxes = float(max(sum(int(t["labels"].shape[0]) for t in targets), 1))

        batch_idx, src_idx, labels_o, src_boxes, tgt_boxes = _prepare_matched(
            outputs, targets, indices)

        l1_sum, giou_sum, ious = box_losses(src_boxes, tgt_boxes)

        losses = {}
        if "boxes" in self.losses:
            losses["loss_bbox"] = l1_sum / num_boxes
            losses["loss_giou"] = giou_sum / num_boxes

        if "vfl" in self.losses:
            # TODO(synk): the [B, Q] target scatters could be folded into the VFL
            # kernel via PrefetchScalarGridSpec; kept as XLA scatters for now.
            target_classes = jnp.full((B, Q), self.num_classes, jnp.int32)
            target_classes = target_classes.at[batch_idx, src_idx].set(labels_o)
            tscore_o = jnp.zeros((B, Q), jnp.float32).at[batch_idx, src_idx].set(
                jax.lax.stop_gradient(ious))
            vfl_total = vfl_loss_sum(pred_logits, target_classes, tscore_o,
                                     self.alpha, self.gamma)
            # torch: loss.mean(1).sum() * Q / num_boxes == loss.sum() / num_boxes
            losses["loss_vfl"] = vfl_total / num_boxes

        # apply weight_dict
        return {k: v * self.weight_dict[k] for k, v in losses.items()
                if k in self.weight_dict}


# ----------------------------- pure-JAX reference (for validation) -----------------------------

def _ref_boxes(src, tgt):
    def to_xyxy(b):
        cx, cy, w, h = b[:, 0], b[:, 1], b[:, 2], b[:, 3]
        return jnp.stack([cx - 0.5 * w, cy - 0.5 * h, cx + 0.5 * w, cy + 0.5 * h], -1)
    s, t = to_xyxy(src), to_xyxy(tgt)
    lt = jnp.maximum(s[:, :2], t[:, :2]); rb = jnp.minimum(s[:, 2:], t[:, 2:])
    wh = jnp.maximum(rb - lt, 0.0); inter = wh[:, 0] * wh[:, 1]
    area_s = (s[:, 2] - s[:, 0]) * (s[:, 3] - s[:, 1])
    area_t = (t[:, 2] - t[:, 0]) * (t[:, 3] - t[:, 1])
    union = area_s + area_t - inter
    iou = inter / union
    clt = jnp.minimum(s[:, :2], t[:, :2]); crb = jnp.maximum(s[:, 2:], t[:, 2:])
    cwh = jnp.maximum(crb - clt, 0.0); carea = cwh[:, 0] * cwh[:, 1]
    giou = iou - (carea - union) / carea
    return jnp.sum(jnp.abs(src - tgt)), jnp.sum(1.0 - giou), iou


def _ref_vfl(logits, target, target_score, alpha, gamma):
    prob = jax.nn.sigmoid(logits)
    weight = alpha * prob ** gamma * (1.0 - target) + target_score
    bce = jnp.maximum(logits, 0.0) - logits * target_score + jnp.log1p(jnp.exp(-jnp.abs(logits)))
    return jnp.sum(jnp.mean(weight * bce, axis=1))


def ref_criterion(outputs, targets, criterion):
    pred_logits = outputs["pred_logits"].astype(jnp.float32)
    B, Q, C = pred_logits.shape
    indices = criterion._matcher(outputs, targets)
    num_boxes = float(max(sum(int(t["labels"].shape[0]) for t in targets), 1))
    batch_idx, src_idx, labels_o, src_boxes, tgt_boxes = _prepare_matched(
        outputs, targets, indices)
    l1_sum, giou_sum, ious = _ref_boxes(src_boxes, tgt_boxes)
    target_classes = jnp.full((B, Q), criterion.num_classes, jnp.int32)
    target_classes = target_classes.at[batch_idx, src_idx].set(labels_o)
    target = jax.nn.one_hot(target_classes, criterion.num_classes + 1,
                            dtype=jnp.float32)[..., :-1]
    tscore_o = jnp.zeros((B, Q), jnp.float32).at[batch_idx, src_idx].set(ious)
    target_score = tscore_o[..., None] * target
    vfl = _ref_vfl(pred_logits, target, target_score, criterion.alpha, criterion.gamma)
    losses = {
        "loss_bbox": l1_sum / num_boxes,
        "loss_giou": giou_sum / num_boxes,
        "loss_vfl": vfl * float(Q) / num_boxes,
    }
    return {k: v * criterion.weight_dict[k] for k, v in losses.items()}


# ----------------------------- main -----------------------------

if __name__ == "__main__":
    key = jax.random.PRNGKey(0)
    B, Q, C = 2, 8, NUM_CLASSES
    k1, k2, k3 = jax.random.split(key, 3)

    pred_logits = jax.random.normal(k1, (B, Q, C), jnp.float32)
    pred_boxes = jax.nn.sigmoid(jax.random.normal(k2, (B, Q, 4), jnp.float32))

    n_per_image = [3, 2]
    targets = []
    for i, n in enumerate(n_per_image):
        ki = jax.random.fold_in(k3, i)
        kl, kc, kw = jax.random.split(ki, 3)
        labels = jax.random.randint(kl, (n,), 0, NUM_CLASSES, jnp.int32)
        cxcy = jax.random.uniform(kc, (n, 2), minval=0.2, maxval=0.8)
        wh = jax.random.uniform(kw, (n, 2), minval=0.1, maxval=0.4)
        targets.append({"labels": labels,
                        "boxes": jnp.concatenate([cxcy, wh], axis=-1).astype(jnp.float32)})

    outputs = {"pred_logits": pred_logits, "pred_boxes": pred_boxes}

    criterion = SetCriterionPallas()
    losses = criterion(outputs, targets)
    losses = {k: jax.block_until_ready(v) for k, v in losses.items()}

    ref = ref_criterion(outputs, targets, criterion)
    # loss_vfl uses the EUP approximate reciprocal (+1 NR step) for sigmoid inside
    # the detached VFL weight term, so it gets a slightly looser tolerance.
    tolerances = {"loss_bbox": (1e-4, 1e-5), "loss_giou": (1e-4, 1e-5),
                  "loss_vfl": (1e-3, 1e-5)}
    for k in losses:
        rtol, atol = tolerances[k]
        assert jnp.allclose(losses[k], ref[k], rtol=rtol, atol=atol), (k, losses[k], ref[k])

    print("KERNEL_OK")
</pallas_src>

<mosaic_0001>
module attributes {stable_mosaic.version = 11 : i64} {
  func.func @_box_loss_kernel(%arg0: memref<1xi32, #tpu.memory_space<smem>>, %arg1: memref<8x128xf32, #tpu.memory_space<vmem>>, %arg2: memref<3x128xf32, #tpu.memory_space<vmem>>) attributes {dimension_semantics = [], scalar_prefetch = 0 : i64, scratch_operands = 0 : i64, tpu.core_type = #tpu.core_type<tc>} {
    %c0 = arith.constant 0 : index
    %c0_0 = arith.constant 0 : index
    %0 = vector.load %arg1[%c0, %c0_0] : memref<8x128xf32, #tpu.memory_space<vmem>>, vector<8x128xf32>
    %1 = tpu.iota {dimensions = array<i32: 1>} : vector<1x128xi32>
    %c0_1 = arith.constant 0 : index
    %2 = memref.load %arg0[%c0_1] : memref<1xi32, #tpu.memory_space<smem>>
    %3 = vector.broadcast %2 : i32 to vector<1x128xi32>
    %4 = arith.cmpi slt, %1, %3 : vector<1x128xi32>
    %5 = arith.extui %4 : vector<1x128xi1> to vector<1x128xi32>
    %6 = arith.sitofp %5 : vector<1x128xi32> to vector<1x128xf32>
    %7 = vector.extract_strided_slice %0 {offsets = [0, 0], sizes = [1, 128], strides = [1, 1]} : vector<8x128xf32> to vector<1x128xf32>
    %8 = vector.extract_strided_slice %0 {offsets = [1, 0], sizes = [1, 128], strides = [1, 1]} : vector<8x128xf32> to vector<1x128xf32>
    %9 = vector.extract_strided_slice %0 {offsets = [2, 0], sizes = [1, 128], strides = [1, 1]} : vector<8x128xf32> to vector<1x128xf32>
    %10 = vector.extract_strided_slice %0 {offsets = [3, 0], sizes = [1, 128], strides = [1, 1]} : vector<8x128xf32> to vector<1x128xf32>
    %11 = vector.extract_strided_slice %0 {offsets = [4, 0], sizes = [1, 128], strides = [1, 1]} : vector<8x128xf32> to vector<1x128xf32>
    %12 = vector.extract_strided_slice %0 {offsets = [5, 0], sizes = [1, 128], strides = [1, 1]} : vector<8x128xf32> to vector<1x128xf32>
    %13 = vector.extract_strided_slice %0 {offsets = [6, 0], sizes = [1, 128], strides = [1, 1]} : vector<8x128xf32> to vector<1x128xf32>
    %14 = vector.extract_strided_slice %0 {offsets = [7, 0], sizes = [1, 128], strides = [1, 1]} : vector<8x128xf32> to vector<1x128xf32>
    %cst = arith.constant 5.000000e-01 : f32
    %15 = vector.broadcast %cst : f32 to vector<1x128xf32>
    %16 = arith.mulf %15, %9 : vector<1x128xf32>
    %17 = arith.subf %7, %16 : vector<1x128xf32>
    %cst_2 = arith.constant 5.000000e-01 : f32
    %18 = vector.broadcast %cst_2 : f32 to vector<1x128xf32>
    %19 = arith.mulf %18, %10 : vector<1x128xf32>
    %20 = arith.subf %8, %19 : vector<1x128xf32>
    %cst_3 = arith.constant 5.000000e-01 : f32
    %21 = vector.broadcast %cst_3 : f32 to vector<1x128xf32>
    %22 = arith.mulf %21, %9 : vector<1x128xf32>
    %23 = arith.addf %7, %22 : vector<1x128xf32>
    %cst_4 = arith.constant 5.000000e-01 : f32
    %24 = vector.broadcast %cst_4 : f32 to vector<1x128xf32>
    %25 = arith.mulf %24, %10 : vector<1x128xf32>
    %26 = arith.addf %8, %25 : vector<1x128xf32>
    %cst_5 = arith.constant 5.000000e-01 : f32
    %27 = vector.broadcast %cst_5 : f32 to vector<1x128xf32>
    %28 = arith.mulf %27, %13 : vector<1x128xf32>
    %29 = arith.subf %11, %28 : vector<1x128xf32>
    %cst_6 = arith.constant 5.000000e-01 : f32
    %30 = vector.broadcast %cst_6 : f32 to vector<1x128xf32>
    %31 = arith.mulf %30, %14 : vector<1x128xf32>
    %32 = arith.subf %12, %31 : vector<1x128xf32>
    %cst_7 = arith.constant 5.000000e-01 : f32
    %33 = vector.broadcast %cst_7 : f32 to vector<1x128xf32>
    %34 = arith.mulf %33, %13 : vector<1x128xf32>
    %35 = arith.addf %11, %34 : vector<1x128xf32>
    %cst_8 = arith.constant 5.000000e-01 : f32
    %36 = vector.broadcast %cst_8 : f32 to vector<1x128xf32>
    %37 = arith.mulf %36, %14 : vector<1x128xf32>
    %38 = arith.addf %12, %37 : vector<1x128xf32>
    %39 = arith.subf %7, %11 : vector<1x128xf32>
    %40 = math.absf %39 : vector<1x128xf32>
    %41 = arith.subf %8, %12 : vector<1x128xf32>
    %42 = math.absf %41 : vector<1x128xf32>
    %43 = arith.addf %40, %42 : vector<1x128xf32>
    %44 = arith.subf %9, %13 : vector<1x128xf32>
    %45 = math.absf %44 : vector<1x128xf32>
    %46 = arith.addf %43, %45 : vector<1x128xf32>
    %47 = arith.subf %10, %14 : vector<1x128xf32>
    %48 = math.absf %47 : vector<1x128xf32>
    %49 = arith.addf %46, %48 : vector<1x128xf32>
    %50 = arith.minimumf %23, %35 : vector<1x128xf32>
    %51 = arith.maximumf %17, %29 : vector<1x128xf32>
    %52 = arith.subf %50, %51 : vector<1x128xf32>
    %cst_9 = arith.constant 0.000000e+00 : f32
    %53 = vector.broadcast %cst_9 : f32 to vector<1x128xf32>
    %54 = arith.maximumf %52, %53 : vector<1x128xf32>
    %55 = arith.minimumf %26, %38 : vector<1x128xf32>
    %56 = arith.maximumf %20, %32 : vector<1x128xf32>
    %57 = arith.subf %55, %56 : vector<1x128xf32>
    %cst_10 = arith.constant 0.000000e+00 : f32
    %58 = vector.broadcast %cst_10 : f32 to vector<1x128xf32>
    %59 = arith.maximumf %57, %58 : vector<1x128xf32>
    %60 = arith.mulf %54, %59 : vector<1x128xf32>
    %61 = arith.subf %23, %17 : vector<1x128xf32>
    %62 = arith.subf %26, %20 : vector<1x128xf32>
    %63 = arith.mulf %61, %62 : vector<1x128xf32>
    %64 = arith.subf %35, %29 : vector<1x128xf32>
    %65 = arith.subf %38, %32 : vector<1x128xf32>
    %66 = arith.mulf %64, %65 : vector<1x128xf32>
    %67 = arith.addf %63, %66 : vector<1x128xf32>
    %68 = arith.subf %67, %60 : vector<1x128xf32>
    %cst_11 = arith.constant 0.000000e+00 : f32
    %69 = vector.broadcast %cst_11 : f32 to vector<1x128xf32>
    %70 = arith.cmpf ogt, %6, %69 : vector<1x128xf32>
    %cst_12 = arith.constant 1.000000e+00 : f32
    %71 = vector.broadcast %cst_12 : f32 to vector<1x128xf32>
    %72 = arith.select %70, %68, %71 : vector<1x128xi1>, vector<1x128xf32>
    %73 = arith.divf %60, %72 : vector<1x128xf32>
    %74 = arith.maximumf %23, %35 : vector<1x128xf32>
    %75 = arith.minimumf %17, %29 : vector<1x128xf32>
    %76 = arith.subf %74, %75 : vector<1x128xf32>
    %77 = arith.maximumf %26, %38 : vector<1x128xf32>
    %78 = arith.minimumf %20, %32 : vector<1x128xf32>
    %79 = arith.subf %77, %78 : vector<1x128xf32>
    %80 = arith.mulf %76, %79 : vector<1x128xf32>
    %cst_13 = arith.constant 0.000000e+00 : f32
    %81 = vector.broadcast %cst_13 : f32 to vector<1x128xf32>
    %82 = arith.cmpf ogt, %6, %81 : vector<1x128xf32>
    %cst_14 = arith.constant 1.000000e+00 : f32
    %83 = vector.broadcast %cst_14 : f32 to vector<1x128xf32>
    %84 = arith.select %82, %80, %83 : vector<1x128xi1>, vector<1x128xf32>
    %85 = arith.subf %80, %68 : vector<1x128xf32>
    %86 = arith.divf %85, %84 : vector<1x128xf32>
    %87 = arith.subf %73, %86 : vector<1x128xf32>
    %88 = arith.mulf %49, %6 : vector<1x128xf32>
    %c0_15 = arith.constant 0 : index
    %c0_16 = arith.constant 0 : index
    %89 = vector.load %arg2[%c0_15, %c0_16] : memref<3x128xf32, #tpu.memory_space<vmem>>, vector<1x128xf32>
    tpu.vector_store %arg2[%c0_15, %c0_16], %88 {strides = array<i32>} : memref<3x128xf32, #tpu.memory_space<vmem>>, vector<1x128xf32>,
    %cst_17 = arith.constant 1.000000e+00 : f32
    %90 = vector.broadcast %cst_17 : f32 to vector<1x128xf32>
    %91 = arith.subf %90, %87 : vector<1x128xf32>
    %92 = arith.mulf %91, %6 : vector<1x128xf32>
    %c1 = arith.constant 1 : index
    %c0_18 = arith.constant 0 : index
    %93 = vector.load %arg2[%c1, %c0_18] : memref<3x128xf32, #tpu.memory_space<vmem>>, vector<1x128xf32>
    tpu.vector_store %arg2[%c1, %c0_18], %92 {strides = array<i32>} : memref<3x128xf32, #tpu.memory_space<vmem>>, vector<1x128xf32>,
    %94 = arith.mulf %73, %6 : vector<1x128xf32>
    %c2 = arith.constant 2 : index
    %c0_19 = arith.constant 0 : index
    %95 = vector.load %arg2[%c2, %c0_19] : memref<3x128xf32, #tpu.memory_space<vmem>>, vector<1x128xf32>
    tpu.vector_store %arg2[%c2, %c0_19], %94 {strides = array<i32>} : memref<3x128xf32, #tpu.memory_space<vmem>>, vector<1x128xf32>,
    return
  }
}

</mosaic_0001>

<bundles_post_ra>
// kernel: tpu_custom_call.1
= control target key start
LH: loop header
LB: loop body
LE: loop exit
PB: predicated region body
PF: predicated region fallthrough
CT: control target
= control target key end

     0   :  { %8 = vsyncpa [#allocation4], 0  ;;  %s195_s0 = inlined_call_operand.<no memory space> [shape: s32[1], index: 0, kind: input, shape index: {}]   ;;  %s196_s1 = inlined_call_operand.hbm [shape: f32[8,128], index: 1, kind: input, shape index: {}]   ;;  %s197_s2 = inlined_call_operand.hbm [shape: f32[3,128], index: 2, kind: output, shape index: {}]  }
   0x1   :  { %9 = vsyncpa [#allocation5], 0  ;;  %s168_s9 = smov [#allocation3]  }
   0x2   :  { %s18_s10 = sshll.u32 %s168_s9, 4  ;;  %s19_s10 = int_to_ptr.vmem [resolvable:$true] %s18_s10 }
   0x3   :  { %s132_s11 = scalar_lea.vmem %s19_s10, 128  ;;  %p137_p1 = scmp.lt.s32.totalorder %s19_s10, %s19_s10 }
   0x4   :  { %p133_p0 = scmp.ne.s32.totalorder %s19_s10, %s132_s11  ;;  %p138_p2 = scmp.lt.s32.totalorder %s132_s11, %s132_s11 }
   0x6   :  { %p139_p3 = por %p138_p2, %p137_p1 }
   0x8   :  { %p140_p4 = pnand %p139_p3, %p133_p0 }
   0xa   :  { %143 = shalt.err (!%p140_p4)
}
   0xb   :  { %21 = dma.hbm_to_vmem [thread:$0]  %s196_s1, 128, %s19_s10, [#allocation4]  }
   0xc   :  { %164 = dma.done.wait [#allocation4], 128  }
   0xd   :  { %165 = vsyncadd [#allocation4], 4294967168  ;;  %v25_v0 = vld [vmem:[#allocation3] sm:$0xff]  ;;  %v26_v1 = vlaneseq  ;;  %v29_v7 = vstv %s195_s0  ;;  %v169_v24 = vmov 0.0   ;;  %s170_s0 = smov [#allocation6]  }
   0xe   :  { %v40_v2 = vrot.slane %v25_v0, 4  ;;  %v33_v3 = vmul.f32 0.5, %v25_v0  ;;  %s107_s1 = sshll.u32 %s170_s0, 4  ;;  %s108_s1 = int_to_ptr.vmem [resolvable:$true] %s107_s1 }
   0xf   :  { %v27_v6 = vand.u32 127, %v26_v1  ;;  %s144_s16 = scalar_lea.vmem %s108_s1, 64  ;;  %p149_p6 = scmp.lt.s32.totalorder %s108_s1, %s108_s1 }
  0x10   :  { %v42_v4 = vsub.f32 %v25_v0, %v40_v2  ;;  %v35_v5 = vrot.slane %v33_v3, 2  ;;  %p145_p5 = scmp.ne.s32.totalorder %s108_s1, %s144_s16  ;;  %p150_p7 = scmp.lt.s32.totalorder %s144_s16, %s144_s16 }
  0x11   :  { %vm30_vm0 = vcmp.lt.s32.totalorder %v27_v6, %v29_v7 }
  0x12   :  { %v43_v8 = vand.u32 2147483647, %v42_v4  ;;  %v37_v9 = vsub.f32 %v25_v0, %v35_v5  ;;  %v38_v10 = vadd.f32 %v35_v5, %v25_v0  ;;  %v116_v25 = vsel %vm30_vm0, 1.0, %v169_v24  ;;  %p151_p8 = por %p150_p7, %p149_p6 }
  0x13   :  { %vm78_vm1 = vcmp.gt.f32.partialorder %v116_v25, 0.0 }
  0x14   :  { %v45_v11 = vrot.slane %v43_v8, 1  ;;  %v48_v12 = vrot.slane %v43_v8, 2  ;;  %v55_v13 = vrot.slane %v38_v10, 4  ;;  %v59_v14 = vrot.slane %v37_v9, 4  ;;  %p152_p9 = pnand %p151_p8, %p145_p5 }
  0x15   :  { %v68_v15 = vsub.f32 %v38_v10, %v37_v9  ;;  %v51_v17 = vrot.slane %v43_v8, 3 }
  0x16   :  { %v47_v16 = vadd.f32 %v45_v11, %v43_v8  ;;  %v57_v18 = vmin.f32 %v38_v10, %v55_v13  ;;  %v82_v19 = vmax.f32 %v38_v10, %v55_v13  ;;  %v61_v20 = vmax.f32 %v37_v9, %v59_v14 }
  0x17   :  { %v70_v21 = vrot.slane %v68_v15, 1  ;;  %v83_v22 = vmin.f32 %v37_v9, %v59_v14 }
  0x18   :  { %v50_v23 = vadd.f32 %v48_v12, %v47_v16  ;;  %v62_v26 = vsub.f32 %v57_v18, %v61_v20 }
  0x19   :  { %v72_v27 = vmul.f32 %v70_v21, %v68_v15  ;;  %v84_v28 = vsub.f32 %v82_v19, %v83_v22 }
  0x1a   :  { %v53_v29 = vadd.f32 %v51_v17, %v50_v23  ;;  %v63_v30 = vmax.f32 %v62_v26, 0.0 }
  0x1b   :  { %v74_v31 = vrot.slane %v72_v27, 4  ;;  %v86_v32 = vrot.slane %v84_v28, 1 }
  0x1c   :  { %v94_v33 = vmul.f32 %v116_v25, %v53_v29  ;;  %v65_v34 = vrot.slane %v63_v30, 1 }
  0x1d   :  { %v76_v35 = vadd.f32 %v74_v31, %v72_v27  ;;  %v88_v36 = vmul.f32 %v86_v32, %v84_v28 }
  0x1e   :  { %95 = vst [vmem:[#allocation6] sm:$0x1] %v94_v33  ;;  %v67_v37 = vmul.f32 %v65_v34, %v63_v30 }
  0x1f   :  { %v89_v38 = vsel %vm78_vm1, %v88_v36, 1.0 }
  0x20   :  { %120 = vrcp.f32 %v89_v38  ;;  %v77_v39 = vsub.f32 %v76_v35, %v67_v37 }
  0x22   :  { %v79_v40 = vsel %vm78_vm1, %v77_v39, 1.0  ;;  %v90_v41 = vsub.f32 %v88_v36, %v77_v39 }
  0x23   :  { %122 = vrcp.f32 %v79_v40 }
  0x2d   :  { %v121_v42 = vpop.eup %120 }
  0x2e   :  { %v92_v43 = vmul.f32 %v121_v42, %v90_v41 }
  0x30   :  { %v123_v44 = vpop.eup %122 }
  0x31   :  { %v81_v45 = vmul.f32 %v123_v44, %v67_v37 }
  0x33   :  { %v93_v46 = vsub.f32 %v81_v45, %v92_v43  ;;  %v99_v47 = vmul.f32 %v116_v25, %v81_v45 }
  0x35   :  { %v96_v48 = vsub.f32 1.0, %v93_v46  ;;  %100 = vst [vmem:[#allocation6 + $0x2] sm:$0x1] %v99_v47 }
  0x37   :  { %v97_v49 = vmul.f32 %v116_v25, %v96_v48 }
  0x39   :  { %98 = vst [vmem:[#allocation6 + $0x1] sm:$0x1] %v97_v49 }
  0x3a   :  { %155 = shalt.err (!%p152_p9)
}
  0x3b   :  { %110 = dma.vmem_to_hbm [thread:$0]  %s108_s1, 64, %s197_s2, [#allocation5]  }
  0x3c   :  { %166 = dma.done.wait [#allocation5], 64  }
  0x3d   :  { %167 = vsyncadd [#allocation5], 4294967232 }
  0x3e   :  { %114 = vsyncpa [#allocation4], 1 }
  0x3f   :  { %115 = vsyncpa [#allocation5], 1 }

</bundles_post_ra>
